<compile_context>
chip_gen: v5e
topology: v5e:2x2
jax: 0.10.0
libtpu: 0.0.40
codegen_flags: <defaults>
</compile_context>

<pallas_src>
import functools

import jax
import jax.numpy as jnp
from jax.experimental import pallas as pl
from jax.experimental.pallas import tpu as pltpu

MID_CHANNELS = 512   # fixed by the module definition


def _round_up(v, m):
    return (v + m - 1) // m * m


# ----------------------------- Pallas kernels ------------------------------ #

def rpn_head_kernel(p_ref, wm_ref, bm_ref, wh_ref, bh_ref, out_ref, acc_ref, *,
                    c_cls, fuse_softmax, roll_plus1_is_prev):
    """Fused RPN head (mid conv-as-matmul + ReLU + fused cls|reg 1x1 conv),
    channel-major / position-last orientation, K (=Cin*k*k) tiled on the grid.

    p_ref  : (TK, TN)    bf16  im2col patch tile, positions along lanes
    wm_ref : (512, TK)   bf16  mid conv weight tile
    bm_ref : (512, 1)    f32   mid conv bias
    wh_ref : (Ctot, 512) bf16  fused cls|reg 1x1 weight
    bh_ref : (Ctot, 1)   f32   fused cls|reg bias
    out_ref: (Ctot, TN)  f32   head output (NCHW ordered); rows [0, c_cls)
                               hold softmaxed cls probs when fuse_softmax.
    acc_ref: (512, TN)   f32   K-accumulator for the mid activation
    """
    kk = pl.program_id(2)

    @pl.when(kk == 0)
    def _init():
        acc_ref[...] = jnp.zeros_like(acc_ref)

    acc_ref[...] += jnp.dot(wm_ref[...], p_ref[...],
                            preferred_element_type=jnp.float32)

    @pl.when(kk == pl.num_programs(2) - 1)
    def _finalize():
        h = jnp.maximum(acc_ref[...] + bm_ref[...], 0.0)     # bias + ReLU (f32)
        h = h.astype(wh_ref.dtype)                           # bf16 feed for 2nd MXU pass
        out = (jnp.dot(wh_ref[...], h, preferred_element_type=jnp.float32)
               + bh_ref[...])
        out_ref[...] = out

        if fuse_softmax:
            # Softmax over adjacent position pairs of the cls rows.  This is
            # exactly the raw NCHW .view(m, n, -1, 2) pairing of the reference
            # module (valid whenever m*n is even, so pairs never straddle a
            # channel row).  Partner lane via XLU roll, parity mask via iota.
            cls = out[:c_cls, :]
            width = cls.shape[-1]
            sh_prev = 1 if roll_plus1_is_prev else width - 1
            sh_next = width - sh_prev
            prv = pltpu.roll(cls, sh_prev, axis=1)           # x[i-1]
            nxt = pltpu.roll(cls, sh_next, axis=1)           # x[i+1]
            lane = jax.lax.broadcasted_iota(jnp.int32, cls.shape, dimension=1)
            partner = jnp.where((lane & 1) == 0, nxt, prv)
            mx = jnp.maximum(cls, partner)
            e_s = jnp.exp(cls - mx)
            e_p = jnp.exp(partner - mx)
            out_ref[:c_cls, :] = e_s * pl.reciprocal(e_s + e_p, approx=True)


def pair_softmax_kernel(x0_ref, x1_ref, p0_ref, p1_ref):
    """Stable 2-way softmax on de-interleaved pairs; elementwise, lane-dense.
    (Fallback path, only used when m*n is odd.)"""
    x0 = x0_ref[...]
    x1 = x1_ref[...]
    mx = jnp.maximum(x0, x1)
    e0 = jnp.exp(x0 - mx)
    e1 = jnp.exp(x1 - mx)
    inv = pl.reciprocal(e0 + e1, approx=True)
    p0_ref[...] = e0 * inv
    p1_ref[...] = e1 * inv


# --------------------------------- glue ------------------------------------ #

def im2col_cm(x, k, s):
    """x: (B, C, H, W) -> patches (B, C*k*k, m*n), channel-major K axis that
    matches the PyTorch conv-weight flattening (c, kh, kw).  Done in the input
    dtype (bf16) so the k*k-inflated intermediate is half-size in HBM."""
    B, C, H, W = x.shape
    m = (H - k) // s + 1
    n = (W - k) // s + 1
    cols = []
    for di in range(k):
        for dj in range(k):
            cols.append(x[:, :, di:di + (m - 1) * s + 1:s,
                              dj:dj + (n - 1) * s + 1:s])     # (B, C, m, n)
    pat = jnp.stack(cols, axis=2)                             # (B, C, k*k, m, n)
    pat = pat.reshape(B, C * k * k, m * n)                    # K = c*k*k + kh*k + kw
    return pat, m, n


def init_params(key, in_channels, k, n_proposals):
    """Deterministic synthetic parameters, pre-flattened to matmul layouts."""
    ks = jax.random.split(key, 6)
    kdim = in_channels * k * k
    w_mid = jax.random.normal(ks[0], (MID_CHANNELS, in_channels, k, k), jnp.float32) * 0.05
    b_mid = jax.random.normal(ks[1], (MID_CHANNELS,), jnp.float32) * 0.05
    w_cls = jax.random.normal(ks[2], (2 * n_proposals, MID_CHANNELS), jnp.float32) * 0.05
    b_cls = jax.random.normal(ks[3], (2 * n_proposals,), jnp.float32) * 0.05
    w_reg = jax.random.normal(ks[4], (4 * n_proposals, MID_CHANNELS), jnp.float32) * 0.05
    b_reg = jax.random.normal(ks[5], (4 * n_proposals,), jnp.float32) * 0.05

    wm = w_mid.reshape(MID_CHANNELS, kdim)                    # (512, Cin*k*k)
    wh = jnp.concatenate([w_cls, w_reg], axis=0)              # fused cls|reg (6K, 512)
    bh = jnp.concatenate([b_cls, b_reg], axis=0)              # (6K,)
    return wm, b_mid, wh, bh


def probe_roll_convention():
    """Tiny one-off kernel (run outside jit) pinning down pltpu.roll's rotation
    direction, so the fused softmax epilogue picks the correct lane partner on
    any backend.  Expected (jnp.roll) convention: roll(x, 1)[i] == x[i-1]."""
    def kern(x_ref, o_ref):
        o_ref[...] = pltpu.roll(x_ref[...], 1, axis=1)
    x = jnp.broadcast_to(jnp.arange(128, dtype=jnp.float32), (8, 128))
    y = pl.pallas_call(kern, out_shape=jax.ShapeDtypeStruct((8, 128), jnp.float32))(x)
    return bool(y[0, 1] == 0.0)


def pair_softmax(pairs, *, lane_width=1024, max_rows=256):
    """pairs: (P, 2) f32 -> softmax over axis=-1.  Fallback (m*n odd) path:
    wide lane-dense blocks (>=1 MiB) to amortize per-step overhead."""
    P = pairs.shape[0]
    rows = -(-P // lane_width)
    tr = min(_round_up(rows, 8), max_rows)
    rows_pad = _round_up(rows, tr)
    tot = rows_pad * lane_width
    x0 = jnp.pad(pairs[:, 0], (0, tot - P)).reshape(rows_pad, lane_width)
    x1 = jnp.pad(pairs[:, 1], (0, tot - P)).reshape(rows_pad, lane_width)
    spec = pl.BlockSpec((tr, lane_width), lambda i: (i, 0))
    p0, p1 = pl.pallas_call(
        pair_softmax_kernel,
        out_shape=(jax.ShapeDtypeStruct((rows_pad, lane_width), jnp.float32),
                   jax.ShapeDtypeStruct((rows_pad, lane_width), jnp.float32)),
        grid=(rows_pad // tr,),
        in_specs=[spec, spec],
        out_specs=(spec, spec),
        compiler_params=pltpu.CompilerParams(dimension_semantics=("parallel",)),
    )(x0, x1)
    return jnp.stack([p0.reshape(-1)[:P], p1.reshape(-1)[:P]], axis=-1)


def _pick_pos_tile(MN, B, max_pos_tile):
    """Position (lane) tile: 256-aligned; if B == 1 split into >=2 tiles so
    both v7x TensorCores get work."""
    if MN <= max_pos_tile:
        tn = _round_up(MN, 256)
        if B == 1 and MN > 256:
            tn = _round_up((MN + 1) // 2, 256)
    else:
        tn = max_pos_tile
    return tn, _round_up(MN, tn)


def _pick_k_tile(kdim, max_k_tile):
    """K tile: bf16-sublane (16) padding for tiny K (pure DMA savings), else
    256-aligned for the 2x256x256 MXU; grid-tiled above max_k_tile."""
    if kdim < 128:
        kpad = _round_up(kdim, 16)
        return kpad, kpad
    kpad = _round_up(kdim, 256)
    if kpad <= max_k_tile:
        return kpad, kpad
    tk = max_k_tile                       # multiple of 256
    return _round_up(kdim, tk), tk


def rpn_forward(x, params, *, k, s, n_proposals,
                max_pos_tile=1024, max_k_tile=1024, roll_plus1_is_prev=True):
    """RPN forward.  max_pos_tile / max_k_tile are 256-multiples; raise
    max_pos_tile to 2048 on v5e/v6e (128 MiB VMEM), keep <= 1024 on v7x."""
    wm, bm, wh, bh = params
    B, C, H, W = x.shape
    kdim = wm.shape[1]
    c_tot = wh.shape[0]
    c_cls = 2 * n_proposals

    # ---- im2col in bf16 (cast BEFORE building the k*k-inflated patches) ----
    x_bf = x.astype(jnp.bfloat16)
    patches, m, n = im2col_cm(x_bf, k, s)             # (B, kdim, m*n) bf16
    MN = m * n

    tn, mn_pad = _pick_pos_tile(MN, B, max_pos_tile)
    kpad, tk = _pick_k_tile(kdim, max_k_tile)
    fuse_softmax = (MN % 2) == 0                       # pairs never straddle rows

    patches = jnp.pad(patches, ((0, 0), (0, kpad - kdim), (0, mn_pad - MN)))
    wm_p = jnp.pad(wm, ((0, 0), (0, kpad - kdim))).astype(jnp.bfloat16)
    wh_p = wh.astype(jnp.bfloat16)
    bm_c = bm.reshape(-1, 1).astype(jnp.float32)       # (512, 1)
    bh_c = bh.reshape(-1, 1).astype(jnp.float32)       # (Ctot, 1)

    kernel = functools.partial(rpn_head_kernel, c_cls=c_cls,
                               fuse_softmax=fuse_softmax,
                               roll_plus1_is_prev=roll_plus1_is_prev)

    # ---- fused head kernel: output is (B, Ctot, m*n), i.e. NCHW directly ----
    out = pl.pallas_call(
        kernel,
        out_shape=jax.ShapeDtypeStruct((B, c_tot, mn_pad), jnp.float32),
        grid=(B, mn_pad // tn, kpad // tk),
        in_specs=[
            pl.BlockSpec((None, tk, tn), lambda b, j, kk: (b, kk, j)),      # patches
            pl.BlockSpec((MID_CHANNELS, tk), lambda b, j, kk: (0, kk)),     # wm
            pl.BlockSpec((MID_CHANNELS, 1), lambda b, j, kk: (0, 0)),       # bm
            pl.BlockSpec((c_tot, MID_CHANNELS), lambda b, j, kk: (0, 0)),   # wh
            pl.BlockSpec((c_tot, 1), lambda b, j, kk: (0, 0)),              # bh
        ],
        out_specs=pl.BlockSpec((None, c_tot, tn), lambda b, j, kk: (b, 0, j)),
        scratch_shapes=[pltpu.VMEM((MID_CHANNELS, tn), jnp.float32)],
        compiler_params=pltpu.CompilerParams(
            dimension_semantics=("parallel", "parallel", "arbitrary"),
            vmem_limit_bytes=48 * 1024 * 1024),
    )(patches, wm_p, bm_c, wh_p, bh_c)

    out = out[:, :, :MN]                               # drop position padding (no-op if aligned)
    cls_flat = out[:, :c_cls, :]
    # Raw NCHW reinterpret: .view(m, n, -1, 4) + Flatten(0, -2) == row-major reshape.
    regs = out[:, c_cls:, :].reshape(-1, 4)            # (m*n*B*K, 4)
    if fuse_softmax:
        probs = cls_flat.reshape(-1, 2)                # already softmaxed in-kernel
    else:
        probs = pair_softmax(cls_flat.reshape(-1, 2))  # fallback (m*n odd)
    return probs, regs


# ----------------------------- pure-JAX reference --------------------------- #

def rpn_reference(x, params, *, k, s, n_proposals):
    """f32 XLA-conv reference mirroring the PyTorch module exactly."""
    wm, bm, wh, bh = params
    B, C, H, W = x.shape
    c_cls = 2 * n_proposals
    dn = ('NCHW', 'OIHW', 'NCHW')
    hp = jax.lax.Precision.HIGHEST
    h = jax.lax.conv_general_dilated(x, wm.reshape(MID_CHANNELS, C, k, k),
                                     (s, s), 'VALID', dimension_numbers=dn,
                                     precision=hp)
    h = jnp.maximum(h + bm.reshape(1, -1, 1, 1), 0.0)
    head = jax.lax.conv_general_dilated(h, wh.reshape(-1, MID_CHANNELS, 1, 1),
                                        (1, 1), 'VALID', dimension_numbers=dn,
                                        precision=hp) + bh.reshape(1, -1, 1, 1)
    cls, reg = head[:, :c_cls], head[:, c_cls:]
    _, _, m, n = h.shape
    probs = jax.nn.softmax(cls.reshape(m, n, -1, 2), axis=-1).reshape(-1, 2)
    regs = reg.reshape(m, n, -1, 4).reshape(-1, 4)
    return probs, regs


# --------------------------------- main ------------------------------------ #

if __name__ == "__main__":
    # Small shapes consistent with the module's forward:
    B, Cin, H, W = 2, 4, 18, 18
    window, stride, n_prop = 3, 1, 3

    key = jax.random.PRNGKey(0)
    kx, kp = jax.random.split(key)
    x = jax.random.normal(kx, (B, Cin, H, W), jnp.float32)
    params = init_params(kp, Cin, window, n_prop)

    roll_is_jnp = probe_roll_convention()

    fwd = jax.jit(functools.partial(rpn_forward, k=window, s=stride,
                                    n_proposals=n_prop,
                                    roll_plus1_is_prev=roll_is_jnp))
    probs, regs = fwd(x, params)
    jax.block_until_ready((probs, regs))

    m = (H - window) // stride + 1
    n = (W - window) // stride + 1
    assert probs.shape == (m * n * B * n_prop, 2), probs.shape
    assert regs.shape == (m * n * B * n_prop, 4), regs.shape
    # softmax rows must sum to 1 (approx reciprocal -> loose tolerance)
    assert bool(jnp.allclose(jnp.sum(probs, axis=-1), 1.0, atol=2e-2))

    # full-module numerical check against an f32 XLA-conv reference (bf16 MXU
    # feeds + approx reciprocal -> relative tolerance, not exact equality)
    probs_ref, regs_ref = rpn_reference(x, params, k=window, s=stride,
                                        n_proposals=n_prop)
    assert bool(jnp.allclose(probs, probs_ref, rtol=5e-2, atol=2e-2)), "probs mismatch"
    assert bool(jnp.allclose(regs, regs_ref, rtol=5e-2, atol=2e-2)), "regs mismatch"

    print("KERNEL_OK")
</pallas_src>

<mosaic_0001>
module attributes {stable_mosaic.version = 11 : i64} {
  func.func @kern(%arg0: memref<8x128xf32, #tpu.memory_space<vmem>>, %arg1: memref<8x128xf32, #tpu.memory_space<vmem>>) attributes {dimension_semantics = [], scalar_prefetch = 0 : i64, scratch_operands = 0 : i64, tpu.core_type = #tpu.core_type<tc>} {
    %c0 = arith.constant 0 : index
    %c0_0 = arith.constant 0 : index
    %0 = vector.load %arg0[%c0, %c0_0] : memref<8x128xf32, #tpu.memory_space<vmem>>, vector<8x128xf32>
    %c1_i32 = arith.constant 1 : i32
    %1 = tpu.dynamic_rotate %0 by %c1_i32 dim 1 : vector<8x128xf32>, i32 -> vector<8x128xf32>
    %c0_1 = arith.constant 0 : index
    %c0_2 = arith.constant 0 : index
    %2 = vector.load %arg1[%c0_1, %c0_2] : memref<8x128xf32, #tpu.memory_space<vmem>>, vector<8x128xf32>
    tpu.vector_store %arg1[%c0_1, %c0_2], %1 {strides = array<i32>} : memref<8x128xf32, #tpu.memory_space<vmem>>, vector<8x128xf32>,
    return
  }
}

</mosaic_0001>

<bundles_post_ra>
// kernel: tpu_custom_call.1
= control target key start
LH: loop header
LB: loop body
LE: loop exit
PB: predicated region body
PF: predicated region fallthrough
CT: control target
= control target key end

     0   :  { %6 = vsyncpa [#allocation3], 0  ;;  %s118_s0 = inlined_call_operand.hbm [shape: f32[8,128], index: 0, kind: input, shape index: {}]   ;;  %s119_s1 = inlined_call_operand.hbm [shape: f32[8,128], index: 1, kind: output, shape index: {}]  }
   0x1   :  { %7 = vsyncpa [#allocation4], 0  ;;  %s13_s8 = sshll.u32 %s118_s0, 4  ;;  %s99_s9 = smov [#allocation2]   ;;  %s14_s8 = int_to_ptr.hbm [resolvable:$true] %s13_s8 }
   0x2   :  { %s15_s10 = sshll.u32 %s99_s9, 4  ;;  %s16_s10 = int_to_ptr.vmem [resolvable:$true] %s15_s10 }
   0x3   :  { %18 = dma.hbm_to_vmem [thread:$0]  %s14_s8, 128, %s16_s10, [#allocation3]  }
   0x4   :  { %95 = dma.done.wait [#allocation3], 128  }
   0x5   :  { %96 = vsyncadd [#allocation3], 4294967168  ;;  %v23_v0 = vld [vmem:[#allocation2] sm:$0xff]  ;;  %s100_s11 = smov 1   ;;  %s101_s12 = smov [#allocation5]  }
   0x6   :  { %24 = vrot.lane.b32.xlu0 %v23_v0, %s100_s11  ;;  %s32_s13 = sshll.u32 %s101_s12, 4  ;;  %s34_s16 = sshll.u32 %s119_s1, 4  ;;  %s33_s13 = int_to_ptr.vmem [resolvable:$true] %s32_s13  ;;  %s35_s16 = int_to_ptr.hbm [resolvable:$true] %s34_s16 }
  0x78   :  { %v25_v1 = vpop.permute.xlu0 %24 }
  0x79   :  { %26 = vst [vmem:[#allocation5] sm:$0xff] %v25_v1 }
  0x7a   :  { %37 = dma.vmem_to_hbm [thread:$0]  %s33_s13, 128, %s35_s16, [#allocation4]  }
  0x7b   :  { %97 = dma.done.wait [#allocation4], 128  }
  0x7c   :  { %98 = vsyncadd [#allocation4], 4294967168 }
  0x7d   :  { %42 = vsyncpa [#allocation3], 1 }
  0x7e   :  { %43 = vsyncpa [#allocation4], 1 }

</bundles_post_ra>
